<compile_context>
chip_gen: v7x
topology: tpu7x:2x2x1
jax: 0.10.0
libtpu: 0.0.40
codegen_flags: <defaults>
</compile_context>

<pallas_src>
import jax
import jax.numpy as jnp
from jax.experimental import pallas as pl
from jax.experimental.pallas import tpu as pltpu


OUT_LANES = 128  # lane-dense padded output width (only columns 0..1 are used)


def ann_kernel(x_ref, w1_ref, b1_ref, wd_ref, bd_ref, o_ref):
    # ---- fc1 + sigmoid (hidden padded to 128; padded lanes give sigmoid(0)=0.5
    #      but contribute nothing downstream since wd's padded rows are 0) ----
    x = x_ref[...]                                              # (TB, 16)
    h = jnp.dot(x, w1_ref[...], preferred_element_type=jnp.float32)  # (TB, 128)
    h = h + b1_ref[...]                                         # broadcast (1, 128)
    h = 1.0 / (1.0 + jnp.exp(-h))                               # sigmoid, exact f32

    # ---- output layer folded into a single logit difference ----
    # softmax([l0, l1])[1] == sigmoid(l1 - l0), exactly.
    d = jnp.dot(h, wd_ref[...], preferred_element_type=jnp.float32)  # (TB, 1)
    d = d + bd_ref[...]                                         # (1, 1) broadcast
    p1 = 1.0 / (1.0 + jnp.exp(-d))                              # class-1 prob
    p0 = 1.0 - p1                                               # class-0 prob

    # ---- lane-dense store: full (TB, 128) block, probs in lanes 0 and 1 ----
    lane = jax.lax.broadcasted_iota(jnp.int32, o_ref.shape, 1)  # (TB, 128)
    out = jnp.where(lane == 0, p0, jnp.where(lane == 1, p1, 0.0))
    o_ref[...] = out.astype(o_ref.dtype)


def _round_up(n, m):
    return ((n + m - 1) // m) * m


def ann_forward(x, w1, b1, w2, b2, *, max_tb=2048):
    """x: (B, 16); w1: (16, 100); b1: (1, 100); w2: (100, 2); b2: (1, 2)."""
    B, F = x.shape
    H = w1.shape[1]                 # 100
    HP = _round_up(H, 128)          # 128 (lane-aligned hidden dim)

    # Tile size: as large as practical (sized for v7x's 64 MiB VMEM with 2x
    # double buffering a (TB,128) f32 stream is ~2 MiB at TB=2048), rounded to
    # the sublane granule.
    TB = min(max_tb, _round_up(B, 8))
    Bp = _round_up(B, TB)

    # Pad batch rows (sliced off at the end).
    xp = x if Bp == B else jnp.pad(x, ((0, Bp - B), (0, 0)))

    # Zero-pad hidden 100 -> 128 (bit-identical results: padded w1 cols / b1
    # entries are 0, and wd's padded rows are 0).
    w1p = jnp.pad(w1, ((0, 0), (0, HP - H)))
    b1p = jnp.pad(b1.reshape(1, -1), ((0, 0), (0, HP - H)))

    # Fold the 2-class softmax into a sigmoid of the logit difference.
    wd = (w2[:, 1] - w2[:, 0]).reshape(-1, 1)                   # (100, 1)
    wd = jnp.pad(wd, ((0, HP - H), (0, 0)))                     # (128, 1)
    b2f = b2.reshape(-1)
    bd = (b2f[1] - b2f[0]).reshape(1, 1)                        # (1, 1)

    grid = (Bp // TB,)
    out = pl.pallas_call(
        ann_kernel,
        out_shape=jax.ShapeDtypeStruct((Bp, OUT_LANES), jnp.float32),
        grid=grid,
        in_specs=[
            pl.BlockSpec((TB, F), lambda i: (i, 0)),    # x tile, streamed
            pl.BlockSpec((F, HP), lambda i: (0, 0)),    # w1, resident
            pl.BlockSpec((1, HP), lambda i: (0, 0)),    # b1, resident
            pl.BlockSpec((HP, 1), lambda i: (0, 0)),    # w_diff, resident
            pl.BlockSpec((1, 1), lambda i: (0, 0)),     # b_diff, resident
        ],
        out_specs=pl.BlockSpec((TB, OUT_LANES), lambda i: (i, 0)),
        compiler_params=pltpu.CompilerParams(
            dimension_semantics=("parallel",),
        ),
    )(xp, w1p, b1p, wd, bd)

    return out[:B, :2]


def init_params(key):
    """Deterministic init mimicking nn.Linear's U(-1/sqrt(fan_in), 1/sqrt(fan_in))."""
    k1, k2, k3, k4 = jax.random.split(key, 4)
    in1, out1 = 16, 100
    in2, out2 = 100, 2
    bound1 = 1.0 / jnp.sqrt(in1)
    bound2 = 1.0 / jnp.sqrt(in2)
    w1 = jax.random.uniform(k1, (in1, out1), jnp.float32, -bound1, bound1)
    b1 = jax.random.uniform(k2, (1, out1), jnp.float32, -bound1, bound1)
    w2 = jax.random.uniform(k3, (in2, out2), jnp.float32, -bound2, bound2)
    b2 = jax.random.uniform(k4, (1, out2), jnp.float32, -bound2, bound2)
    return w1, b1, w2, b2


if __name__ == "__main__":
    key = jax.random.PRNGKey(0)
    k_x, k_p = jax.random.split(key)

    B = 8  # small demo batch (kernel scales to large B via the batch grid)
    x = jax.random.normal(k_x, (B, 16), jnp.float32)
    w1, b1, w2, b2 = init_params(k_p)

    out = ann_forward(x, w1, b1, w2, b2)
    out = jax.block_until_ready(out)

    # sanity check against pure-JAX reference
    h_ref = jax.nn.sigmoid(x @ w1 + b1)
    y_ref = jax.nn.softmax(h_ref @ w2 + b2, axis=1)
    assert out.shape == (B, 2)
    assert jnp.allclose(out, y_ref, atol=1e-5), "mismatch vs reference"
    assert jnp.allclose(jnp.sum(out, axis=1), 1.0, atol=1e-5)

    print("KERNEL_OK")
</pallas_src>

<mosaic_0001>
module attributes {stable_mosaic.version = 11 : i64} {
  func.func @ann_kernel(%arg0: i32, %arg1: memref<8x16xf32, #tpu.memory_space<vmem>>, %arg2: memref<16x128xf32, #tpu.memory_space<vmem>>, %arg3: memref<1x128xf32, #tpu.memory_space<vmem>>, %arg4: memref<128x1xf32, #tpu.memory_space<vmem>>, %arg5: memref<1x1xf32, #tpu.memory_space<vmem>>, %arg6: memref<8x128xf32, #tpu.memory_space<vmem>>) attributes {dimension_semantics = [#tpu.dimension_semantics<parallel>], iteration_bounds = array<i64: 1>, scalar_prefetch = 0 : i64, scratch_operands = 0 : i64, tpu.core_type = #tpu.core_type<tc>, window_params = [{transform_indices = @transform_0, window_bounds = array<i64: 8, 16>}, {pipeline_mode = #tpu.pipeline_mode<synchronous>, transform_indices = @transform_1, window_bounds = array<i64: 16, 128>}, {pipeline_mode = #tpu.pipeline_mode<synchronous>, transform_indices = @transform_2, window_bounds = array<i64: 1, 128>}, {pipeline_mode = #tpu.pipeline_mode<synchronous>, transform_indices = @transform_3, window_bounds = array<i64: 128, 1>}, {pipeline_mode = #tpu.pipeline_mode<synchronous>, transform_indices = @transform_4, window_bounds = array<i64: 1, 1>}, {transform_indices = @transform_5, window_bounds = array<i64: 8, 128>}]} {
    %c0 = arith.constant 0 : index
    %c0_0 = arith.constant 0 : index
    %0 = vector.load %arg1[%c0, %c0_0] : memref<8x16xf32, #tpu.memory_space<vmem>>, vector<8x16xf32>
    %c0_1 = arith.constant 0 : index
    %c0_2 = arith.constant 0 : index
    %1 = vector.load %arg2[%c0_1, %c0_2] : memref<16x128xf32, #tpu.memory_space<vmem>>, vector<16x128xf32>
    %cst = arith.constant dense<0.000000e+00> : vector<8x128xf32>
    %2 = tpu.matmul %0, %1, %cst {dimension_numbers = #tpu.dot_dimension_numbers<[1], [0], [0], [1], [0, 0, 1, 1], [], []>} : vector<8x16xf32>, vector<16x128xf32>, vector<8x128xf32> -> vector<8x128xf32>
    %c0_3 = arith.constant 0 : index
    %c0_4 = arith.constant 0 : index
    %3 = vector.load %arg3[%c0_3, %c0_4] : memref<1x128xf32, #tpu.memory_space<vmem>>, vector<1x128xf32>
    %4 = vector.broadcast %3 : vector<1x128xf32> to vector<8x128xf32>
    %5 = arith.addf %2, %4 : vector<8x128xf32>
    %cst_5 = arith.constant 0.000000e+00 : f32
    %6 = vector.broadcast %cst_5 : f32 to vector<8x128xf32>
    %7 = arith.subf %6, %5 : vector<8x128xf32>
    %8 = math.exp %7 : vector<8x128xf32>
    %cst_6 = arith.constant 1.000000e+00 : f32
    %9 = vector.broadcast %cst_6 : f32 to vector<8x128xf32>
    %10 = arith.addf %9, %8 : vector<8x128xf32>
    %cst_7 = arith.constant 1.000000e+00 : f32
    %11 = vector.broadcast %cst_7 : f32 to vector<8x128xf32>
    %12 = arith.divf %11, %10 : vector<8x128xf32>
    %c0_8 = arith.constant 0 : index
    %c0_9 = arith.constant 0 : index
    %13 = vector.load %arg4[%c0_8, %c0_9] : memref<128x1xf32, #tpu.memory_space<vmem>>, vector<128x1xf32>
    %cst_10 = arith.constant dense<0.000000e+00> : vector<8x1xf32>
    %14 = tpu.matmul %12, %13, %cst_10 {dimension_numbers = #tpu.dot_dimension_numbers<[1], [0], [0], [1], [0, 0, 1, 1], [], []>} : vector<8x128xf32>, vector<128x1xf32>, vector<8x1xf32> -> vector<8x1xf32>
    %c0_11 = arith.constant 0 : index
    %c0_12 = arith.constant 0 : index
    %15 = vector.load %arg5[%c0_11, %c0_12] : memref<1x1xf32, #tpu.memory_space<vmem>>, vector<1x1xf32>
    %16 = vector.broadcast %15 : vector<1x1xf32> to vector<8x1xf32>
    %17 = arith.addf %14, %16 : vector<8x1xf32>
    %cst_13 = arith.constant 0.000000e+00 : f32
    %18 = vector.broadcast %cst_13 : f32 to vector<8x1xf32>
    %19 = arith.subf %18, %17 : vector<8x1xf32>
    %20 = math.exp %19 : vector<8x1xf32>
    %cst_14 = arith.constant 1.000000e+00 : f32
    %21 = vector.broadcast %cst_14 : f32 to vector<8x1xf32>
    %22 = arith.addf %21, %20 : vector<8x1xf32>
    %cst_15 = arith.constant 1.000000e+00 : f32
    %23 = vector.broadcast %cst_15 : f32 to vector<8x1xf32>
    %24 = arith.divf %23, %22 : vector<8x1xf32>
    %cst_16 = arith.constant 1.000000e+00 : f32
    %25 = vector.broadcast %cst_16 : f32 to vector<8x1xf32>
    %26 = arith.subf %25, %24 : vector<8x1xf32>
    %27 = tpu.iota {dimensions = array<i32: 1>} : vector<8x128xi32>
    %c0_i32 = arith.constant 0 : i32
    %28 = vector.broadcast %c0_i32 : i32 to vector<8x128xi32>
    %29 = arith.cmpi eq, %27, %28 : vector<8x128xi32>
    %c1_i32 = arith.constant 1 : i32
    %30 = vector.broadcast %c1_i32 : i32 to vector<8x128xi32>
    %31 = arith.cmpi eq, %27, %30 : vector<8x128xi32>
    %cst_17 = arith.constant 0.000000e+00 : f32
    %32 = vector.shape_cast %24 : vector<8x1xf32> to vector<8x1xf32>
    %33 = vector.broadcast %32 : vector<8x1xf32> to vector<8x128xf32>
    %34 = vector.broadcast %cst_17 : f32 to vector<8x128xf32>
    %35 = arith.select %31, %33, %34 : vector<8x128xi1>, vector<8x128xf32>
    %36 = vector.shape_cast %26 : vector<8x1xf32> to vector<8x1xf32>
    %37 = vector.broadcast %36 : vector<8x1xf32> to vector<8x128xf32>
    %38 = arith.select %29, %37, %35 : vector<8x128xi1>, vector<8x128xf32>
    %c0_18 = arith.constant 0 : index
    %c0_19 = arith.constant 0 : index
    %39 = vector.load %arg6[%c0_18, %c0_19] : memref<8x128xf32, #tpu.memory_space<vmem>>, vector<8x128xf32>
    tpu.vector_store %arg6[%c0_18, %c0_19], %38 {strides = array<i32>} : memref<8x128xf32, #tpu.memory_space<vmem>>, vector<8x128xf32>,
    return
  }
  func.func @transform_0(%arg0: i32) -> (i32, i32) {
    %c0_i32 = arith.constant 0 : i32
    %c0_i32_0 = arith.constant 0 : i32
    return %arg0, %c0_i32 : i32, i32
  }
  func.func @transform_1(%arg0: i32) -> (i32, i32) {
    %c0_i32 = arith.constant 0 : i32
    %c0_i32_0 = arith.constant 0 : i32
    %c0_i32_1 = arith.constant 0 : i32
    return %c0_i32, %c0_i32_0 : i32, i32
  }
  func.func @transform_2(%arg0: i32) -> (i32, i32) {
    %c0_i32 = arith.constant 0 : i32
    %c0_i32_0 = arith.constant 0 : i32
    %c0_i32_1 = arith.constant 0 : i32
    return %c0_i32, %c0_i32_0 : i32, i32
  }
  func.func @transform_3(%arg0: i32) -> (i32, i32) {
    %c0_i32 = arith.constant 0 : i32
    %c0_i32_0 = arith.constant 0 : i32
    %c0_i32_1 = arith.constant 0 : i32
    return %c0_i32, %c0_i32_0 : i32, i32
  }
  func.func @transform_4(%arg0: i32) -> (i32, i32) {
    %c0_i32 = arith.constant 0 : i32
    %c0_i32_0 = arith.constant 0 : i32
    %c0_i32_1 = arith.constant 0 : i32
    return %c0_i32, %c0_i32_0 : i32, i32
  }
  func.func @transform_5(%arg0: i32) -> (i32, i32) {
    %c0_i32 = arith.constant 0 : i32
    %c0_i32_0 = arith.constant 0 : i32
    return %arg0, %c0_i32 : i32, i32
  }
}

</mosaic_0001>

<bundles_post_ra>
// kernel: tpu_custom_call.1
= control target key start
LH: loop header
LB: loop body
LE: loop exit
PB: predicated region body
PF: predicated region fallthrough
CT: control target
= control target key end

     0   :  { %s484_s0 = inlined_call_operand.vmem [shape: f32[8,16], index: 0, kind: input, shape index: {}]   ;;  %s485_s1 = inlined_call_operand.vmem [shape: f32[16,128], index: 1, kind: input, shape index: {}]   ;;  %s486_s2 = inlined_call_operand.vmem [shape: f32[1,128], index: 2, kind: input, shape index: {}]   ;;  %s487_s3 = inlined_call_operand.vmem [shape: f32[128,1], index: 3, kind: input, shape index: {}]   ;;  %s488_s4 = inlined_call_operand.<no memory space> [shape: f32[1,1], index: 4, kind: input, shape index: {}]   ;;  %s489_s5 = inlined_call_operand.hbm [shape: f32[8,128], index: 5, kind: output, shape index: {}]  }
   0x1   :  { %v10_v0 = vstv %s488_s4 }
   0x2   :  { %11 = vst [vmem:[#allocation2] sm:$0x1] %v10_v0 }
   0x3   :  { %v24_v1 = vld [vmem:[%s485_s1] sm:$0xff]  ;;  %v25_v2 = vld [vmem:[%s485_s1 + $0x8] sm:$0xff]  ;;  %v374_v3 = vmov 0.0|0.0   ;;  %vm375_vm0 = vmmov 0   ;;  %v376_v5 = vmov 0.0  }
   0x4   :  { %309 = vmatprep.subr.bf16.mxu0 %v374_v3  ;;  %v310_v4 = vpack.c.bf16 %v25_v2, %v24_v1  ;;  %271 = vmatprep.mubr.msk.f32.mxu0 %vm375_vm0, %v376_v5 }
   0x5   :  { %12 = vsyncpa [#allocation4], 0  ;;  %312 = vmatprep.subr.bf16.mxu1 %v374_v3  ;;  %306 = vmatprep.mubr.msk.f32.mxu1 %vm375_vm0, %v376_v5  ;;  %v23_v6 = vld [vmem:[%s484_s0] sm:$0xff]  ;;  %vm33_vm1 = vcmask 130048   ;;  %v114_v8 = vld [vmem:[%s487_s3 + $0x8] sm:$0xff]  ;;  %v377_v40 = vmov 0   ;;  %v213_v51 = vlaneseq }
   0x6   :  { %311 = vmatpush3.bf16.msra.mxu0 %v310_v4  ;;  %v113_v7 = vld [vmem:[%s487_s3] sm:$0xff]  ;;  %v115_v10 = vld [vmem:[%s487_s3 + $0x10] sm:$0xff]  ;;  %v116_v11 = vld [vmem:[%s487_s3 + $0x18] sm:$0xff]  ;;  %341 = vset.pattern.permute.xlu0 %v377_v40 }
   0x7   :  { %v313_v9 = vpack.c.bf16 %v114_v8, %v113_v7  ;;  %v316_v12 = vpack.c.bf16 %v116_v11, %v115_v10  ;;  %v117_v13 = vld [vmem:[%s487_s3 + $0x20] sm:$0xff]  ;;  %v118_v14 = vld [vmem:[%s487_s3 + $0x28] sm:$0xff]  ;;  %v119_v16 = vld [vmem:[%s487_s3 + $0x30] sm:$0xff]  ;;  %v214_v52 = vand.u32 127, %v213_v51 }
   0x8   :  { %v319_v15 = vpack.c.bf16 %v118_v14, %v117_v13  ;;  %v120_v17 = vld [vmem:[%s487_s3 + $0x38] sm:$0xff]  ;;  %v121_v19 = vld [vmem:[%s487_s3 + $0x40] sm:$0xff]  ;;  %v122_v20 = vld [vmem:[%s487_s3 + $0x48] sm:$0xff] }
   0x9   :  { %272 = vmatmul.mubr.msk.f32.vlgmr.msra.gmra.mrb[0].mxu0 %vm33_vm1, %v23_v6  ;;  %314 = vmatpush3.bf16.msra.mxu1 %v313_v9  ;;  %v322_v18 = vpack.c.bf16 %v120_v17, %v119_v16  ;;  %v325_v21 = vpack.c.bf16 %v122_v20, %v121_v19  ;;  %v123_v22 = vld [vmem:[%s487_s3 + $0x50] sm:$0xff]  ;;  %v124_v23 = vld [vmem:[%s487_s3 + $0x58] sm:$0xff]  ;;  %v125_v25 = vld [vmem:[%s487_s3 + $0x60] sm:$0xff]  ;;  %vm216_vm2 = vcmp.eq.s32.totalorder %v214_v52, 1  ;;  %vm215_vm3 = vcmp.eq.s32.totalorder %v214_v52, 0 }
   0xa   :  { %315 = vmatprep.subr.bf16.mxu1 %v374_v3  ;;  %v328_v24 = vpack.c.bf16 %v124_v23, %v123_v22  ;;  %v126_v26 = vld [vmem:[%s487_s3 + $0x68] sm:$0xff]  ;;  %v127_v28 = vld [vmem:[%s487_s3 + $0x70] sm:$0xff]  ;;  %v128_v29 = vld [vmem:[%s487_s3 + $0x78] sm:$0xff] }
   0xb   :  { %v331_v27 = vpack.c.bf16 %v126_v26, %v125_v25  ;;  %v334_v30 = vpack.c.bf16 %v128_v29, %v127_v28  ;;  %v244_v31 = vld [vmem:[%s486_s2] ss:$0 sm:$0xff]  ;;  %s378_s2 = smov [#allocation3]  }
   0xc   :  { %v246_v41 = vld [vmem:[#allocation2] ss:$0 sm:$0xff]  ;;  %s236_s3 = sshll.u32 %s378_s2, 4  ;;  %s237_s3 = int_to_ptr.vmem [resolvable:$true] %s236_s3 }
   0xd   :  { %317 = vmatpush3.bf16.msra.mxu1 %v316_v12  ;;  %s350_s30 = scalar_lea.vmem %s237_s3, 128  ;;  %p355_p1 = scmp.lt.s32.totalorder %s237_s3, %s237_s3 }
   0xe   :  { %318 = vmatprep.subr.bf16.mxu1 %v374_v3  ;;  %p351_p0 = scmp.ne.s32.totalorder %s237_s3, %s350_s30  ;;  %p356_p2 = scmp.lt.s32.totalorder %s350_s30, %s350_s30 }
  0x10   :  { %p357_p3 = por %p356_p2, %p355_p1 }
  0x11   :  { %320 = vmatpush3.bf16.msra.mxu1 %v319_v15 }
  0x12   :  { %321 = vmatprep.subr.bf16.mxu1 %v374_v3  ;;  %p358_p4 = pnand %p357_p3, %p351_p0 }
  0x15   :  { %323 = vmatpush3.bf16.msra.mxu1 %v322_v18 }
  0x16   :  { %324 = vmatprep.subr.bf16.mxu1 %v374_v3 }
  0x19   :  { %326 = vmatpush3.bf16.msra.mxu1 %v325_v21 }
  0x1a   :  { %327 = vmatprep.subr.bf16.mxu1 %v374_v3 }
  0x1d   :  { %329 = vmatpush3.bf16.msra.mxu1 %v328_v24 }
  0x1e   :  { %330 = vmatprep.subr.bf16.mxu1 %v374_v3 }
  0x21   :  { %332 = vmatpush3.bf16.msra.mxu1 %v331_v27 }
  0x22   :  { %333 = vmatprep.subr.bf16.mxu1 %v374_v3 }
  0x25   :  { %335 = vmatpush3.bf16.msra.mxu1 %v334_v30 }
  0xdc   :  { %v103_v32 = vpop.f32.mrb[0].mxu0 }
  0xdd   :  { %v104_v33 = vadd.f32 %v244_v31, %v103_v32  ;;  %v273_v34 = vpop.f32.mrb[1].mxu0 }
  0xdf   :  { %v107_v35 = vsub.f32 0.0, %v104_v33 }
  0xe1   :  { %v108_v36 = vmul.f32 1.442695, %v107_v35 }
  0xe3   :  { %342 = vpow2.f32 %v108_v36 }
  0xed   :  { %v343_v37 = vpop.eup %342 }
  0xee   :  { %v110_v38 = vadd.f32 1.0, %v343_v37 }
  0xf0   :  { %344 = vrcp.f32 %v110_v38 }
  0xfa   :  { %v345_v39 = vpop.eup %344 }
  0xfb   :  { %307 = vmatmul.mubr.f32.vlgmr.msra.gmra.mrb[0].mxu1 %v345_v39 }
 0x1ce   :  { %v202_v42 = vpop.f32.mrb[0].mxu1 }
 0x1cf   :  { %v203_v43 = vadd.f32 %v246_v41, %v202_v42  ;;  %v308_v44 = vpop.f32.mrb[1].mxu1 }
 0x1d1   :  { %v206_v45 = vsub.f32 0.0, %v203_v43 }
 0x1d3   :  { %v207_v46 = vmul.f32 1.442695, %v206_v45 }
 0x1d5   :  { %346 = vpow2.f32 %v207_v46 }
 0x1df   :  { %v347_v47 = vpop.eup %346 }
 0x1e0   :  { %v209_v48 = vadd.f32 1.0, %v347_v47 }
 0x1e2   :  { %348 = vrcp.f32 %v209_v48 }
 0x1ec   :  { %v349_v49 = vpop.eup %348 }
 0x1ed   :  { %219 = vperm.xlu0 %341, %v349_v49   ;;  %v212_v50 = vsub.f32 1.0, %v349_v49 }
 0x1f1   :  { %225 = vperm.xlu0 %341, %v212_v50  }
 0x26c   :  { %v220_v53 = vpop.permute.xlu0 %219 }
 0x26d   :  { %v222_v54 = vsel %vm216_vm2, %v220_v53, 0.0 }
 0x270   :  { %v226_v55 = vpop.permute.xlu0 %225 }
 0x271   :  { %v228_v56 = vsel %vm215_vm3, %v226_v55, %v222_v54 }
 0x272   :  { %229 = vst [vmem:[#allocation3] sm:$0xff] %v228_v56 }
 0x273   :  { %361 = shalt.err (!%p358_p4)
}
 0x274   :  { %s362_s7 = scalar_lea.hbm %s489_s5, 128 }
 0x275   :  { %p363_p5 = scmp.ne.s32.totalorder %s489_s5, %s362_s7  ;;  %p366_p6 = scmp.lt.u32.totalorder %s362_s7, %s489_s5 }
 0x277   :  { %p368_p7 = pnand %p366_p6, %p363_p5 }
 0x279   :  { %371 = shalt.err (!%p368_p7)
}
 0x27a   :  { %239 = dma.vmem_to_hbm [thread:$0]  %s237_s3, 128, %s489_s5, [#allocation4]  }
 0x27b   :  { %372 = dma.done.wait [#allocation4], 128  }
 0x27c   :  { %373 = vsyncadd [#allocation4], 4294967168 }
 0x27d   :  { %243 = vsyncpa [#allocation4], 1 }

</bundles_post_ra>
